<compile_context>
chip_gen: v7x
topology: tpu7x:2x2x1
jax: 0.10.0
libtpu: 0.0.40
codegen_flags: <defaults>
</compile_context>

<pallas_src>
import functools

import jax
import jax.numpy as jnp
from jax.experimental import pallas as pl
from jax.experimental.pallas import tpu as pltpu


def _round_up(x, m):
    return ((x + m - 1) // m) * m


# --------------------------------------------------------------------------
# Fused kernel: TensorLayer (numeric) + UnivariateOneHotEncodingLayer (cat.)
# --------------------------------------------------------------------------
def _gam_kernel(nidx, cidx, layer_dims, w_offs, b_offs, cmax,
                s_pad, f_pad, d_pad, activation, has_num, has_cat, *refs):
    # refs: xP_ref, [w_tbl_ref, b_tbl_ref], [cb_tbl_ref, gb_ref], out_ref
    #   xP_ref:  (s_pad + f_pad, TILE_B) f32  packed feature rows, batch on lanes
    #   w_tbl:   (s_pad, sum H_out*H_in) f32  VMEM-resident packed weights
    #   b_tbl:   (s_pad, sum H_out)      f32  VMEM-resident packed biases
    #   cb_tbl:  (f_pad, cmax)           f32  class bias + global bias (folded)
    #   gb:      (f_pad, 1)              f32  global bias (oob-index fallback)
    #   out_ref: (d_pad, TILE_B)         f32  original feature-row order
    x_ref = refs[0]
    pos = 1
    if has_num:
        w_ref, b_ref = refs[pos], refs[pos + 1]
        pos += 2
    if has_cat:
        cb_ref, gb_ref = refs[pos], refs[pos + 1]
        pos += 2
    out_ref = refs[pos]
    tile = x_ref.shape[1]

    # Zero the whole output block once (covers uncovered features + pad rows).
    out_ref[...] = jnp.zeros((d_pad, tile), jnp.float32)

    if has_num:
        w_tbl = w_ref[...]                       # (s_pad, W_cols)
        b_tbl = b_ref[...]                       # (s_pad, B_cols)
        # Layer-0 input: one scalar per subnet -> a single (s_pad, tile) slab.
        h = [x_ref[0:s_pad, :]]
        n_layers = len(layer_dims) - 1
        for li in range(n_layers):
            h_in, h_out = layer_dims[li], layer_dims[li + 1]
            woff, boff = w_offs[li], b_offs[li]
            new_h = []
            for o in range(h_out):
                base = woff + o * h_in
                # Tiny contraction (1..8): broadcast MACs over full
                # (s_pad, tile) slabs on the VPU.
                acc = w_tbl[:, base:base + 1] * h[0]
                for k in range(1, h_in):
                    acc = acc + w_tbl[:, base + k:base + k + 1] * h[k]
                acc = acc + b_tbl[:, boff + o:boff + o + 1]
                if li < n_layers - 1:
                    acc = activation(acc)
                new_h.append(acc)
            h = new_h
        n_out = h[0]                              # (s_pad, tile), last width 1
        for s, d in enumerate(nidx):
            out_ref[d:d + 1, :] = n_out[s:s + 1, :]

    if has_cat:
        cb_tbl = cb_ref[...]                      # (f_pad, cmax), gbias folded
        # Indices travel as f32 rows of the packed input; truncate like .long().
        xi = x_ref[s_pad:s_pad + f_pad, :].astype(jnp.int32)
        # Init with the global bias (oob / negative indices -> gbias only,
        # matching jax.nn.one_hot semantics; torch F.one_hot would raise).
        acc = jnp.broadcast_to(gb_ref[...], (f_pad, tile))
        # Classes are mutually exclusive -> pure compare+select, no adds.
        # TODO(synk): for cmax >> 32 switch to a table gather so per-class lane
        # splats don't saturate the 2 XLUs on v6e/v7x.
        for c in range(cmax):
            acc = jnp.where(xi == c, cb_tbl[:, c:c + 1], acc)
        for f, d in enumerate(cidx):
            out_ref[d:d + 1, :] = acc[f:f + 1, :]


# --------------------------------------------------------------------------
# pyGAMNet forward (wrapper: pack once, one pallas_call, unpack once)
# --------------------------------------------------------------------------
def pygamnet_forward(inputs, nfeature_index_list, cfeature_index_list,
                     n_weights, n_biases, class_bias_list, global_bias_list,
                     num_classes_list, activation, *, tile_b=2048):
    B, D = inputs.shape
    has_num = len(nfeature_index_list) > 0
    has_cat = len(cfeature_index_list) > 0
    if not has_num and not has_cat:
        return jnp.zeros((B, D), jnp.float32)

    nidx = tuple(int(i) for i in nfeature_index_list)
    cidx = tuple(int(i) for i in cfeature_index_list)
    S, F = len(nidx), len(cidx)
    s_pad = _round_up(S, 8) if has_num else 0
    f_pad = _round_up(F, 8) if has_cat else 0
    d_pad = _round_up(D, 8)
    r_pad = s_pad + f_pad

    # Batch tiling: big lane tiles (per-step overhead amortization); keep >=2
    # grid steps when the batch allows so both v7x TensorCores get work.
    b_ceil = _round_up(B, 128)
    tile = max(128, min(tile_b, b_ceil))
    if b_ceil // tile < 2 and b_ceil >= 256:
        tile = _round_up((b_ceil + 1) // 2, 128)
    b_pad = _round_up(B, tile)

    # Pack the input once: numeric rows then categorical rows, batch on lanes.
    xT = inputs.astype(jnp.float32).T                      # (D, B)
    xP = jnp.zeros((r_pad, b_pad), jnp.float32)
    if has_num:
        xP = xP.at[:S, :B].set(xT[jnp.asarray(nidx), :])
    if has_cat:
        xP = xP.at[s_pad:s_pad + F, :B].set(xT[jnp.asarray(cidx), :])

    args = [xP]
    in_specs = [pl.BlockSpec((r_pad, tile), lambda i: (0, i))]

    layer_dims, w_offs, b_offs = (), (), ()
    if has_num:
        layer_dims = tuple([int(n_weights[0].shape[1])] +
                           [int(w.shape[2]) for w in n_weights])
        w_cols, b_cols, w_off_l, b_off_l = [], [], [], []
        wc = bc = 0
        for w, b in zip(n_weights, n_biases):
            w = w.astype(jnp.float32)                      # (S, H_in, H_out)
            b = b.astype(jnp.float32)                      # (S, H_out)
            h_in, h_out = int(w.shape[1]), int(w.shape[2])
            w_off_l.append(wc)
            b_off_l.append(bc)
            # column o*h_in + k  <-  w[s, k, o]
            w_cols.append(jnp.transpose(w, (0, 2, 1)).reshape(S, h_out * h_in))
            b_cols.append(b.reshape(S, h_out))
            wc += h_out * h_in
            bc += h_out
        w_tbl = jnp.zeros((s_pad, wc), jnp.float32).at[:S].set(
            jnp.concatenate(w_cols, axis=1))
        b_tbl = jnp.zeros((s_pad, bc), jnp.float32).at[:S].set(
            jnp.concatenate(b_cols, axis=1))
        w_offs, b_offs = tuple(w_off_l), tuple(b_off_l)
        args += [w_tbl, b_tbl]
        in_specs += [pl.BlockSpec((s_pad, wc), lambda i: (0, 0)),   # resident
                     pl.BlockSpec((s_pad, bc), lambda i: (0, 0))]   # resident

    cmax = 0
    if has_cat:
        cmax = int(max(num_classes_list))
        cb = jnp.zeros((f_pad, cmax), jnp.float32)
        gb = jnp.zeros((f_pad, 1), jnp.float32)
        for i, c in enumerate(num_classes_list):
            g = global_bias_list[i].reshape(()).astype(jnp.float32)
            gb = gb.at[i, 0].set(g)
            cb = cb.at[i, :].set(g)                         # oob -> gbias only
            cb = cb.at[i, :c].set(
                class_bias_list[i].reshape(-1).astype(jnp.float32) + g)
        args += [cb, gb]
        in_specs += [pl.BlockSpec((f_pad, cmax), lambda i: (0, 0)),  # resident
                     pl.BlockSpec((f_pad, 1), lambda i: (0, 0))]     # resident

    kernel = functools.partial(
        _gam_kernel, nidx, cidx, layer_dims, w_offs, b_offs, cmax,
        s_pad, f_pad, d_pad, activation, has_num, has_cat)

    outT = pl.pallas_call(
        kernel,
        out_shape=jax.ShapeDtypeStruct((d_pad, b_pad), jnp.float32),
        grid=(b_pad // tile,),
        in_specs=in_specs,
        out_specs=pl.BlockSpec((d_pad, tile), lambda i: (0, i)),
        compiler_params=pltpu.CompilerParams(
            dimension_semantics=("parallel",)),
    )(*args)

    return outT[:D, :B].T                                    # (B, D)


# --------------------------------------------------------------------------
# Pure-JAX reference (mirrors the torch module)
# --------------------------------------------------------------------------
def _reference(inputs, nidx, cidx, n_weights, n_biases, class_bias_list,
               global_bias_list, num_classes_list, activation):
    B, D = inputs.shape
    out = jnp.zeros((B, D), jnp.float32)
    if len(nidx) > 0:
        xs = inputs[:, jnp.asarray(nidx)].T[:, :, None]            # (S, B, 1)
        L = len(n_weights) - 1
        for i in range(L):
            xs = activation(jnp.matmul(xs, n_weights[i])
                            + n_biases[i][:, None, :])
        xs = jnp.matmul(xs, n_weights[-1]) + n_biases[-1][:, None, :]
        out = out.at[:, jnp.asarray(nidx)].set(
            jnp.squeeze(jnp.transpose(xs, (1, 0, 2)), axis=2))
    if len(cidx) > 0:
        xc = inputs[:, jnp.asarray(cidx)]
        cols = []
        for i, c in enumerate(num_classes_list):
            oh = jax.nn.one_hot(xc[:, i].astype(jnp.int32), c,
                                dtype=jnp.float32)
            cols.append(oh @ class_bias_list[i] + global_bias_list[i])
        out = out.at[:, jnp.asarray(cidx)].set(jnp.concatenate(cols, axis=1))
    return out


if __name__ == "__main__":
    key = jax.random.PRNGKey(0)

    B = 16
    nfeature_index_list = [0, 2, 4, 5]
    cfeature_index_list = [1, 3, 6]
    num_classes_list = [3, 5, 4]
    subnet_arch = [8, 4]
    D = 7
    activation = lambda v: jnp.maximum(v, 0.0)   # ReLU (activation_func arg)

    S_n = len(nfeature_index_list)
    layer_dims = [1] + subnet_arch + [1]

    keys = jax.random.split(key, 16)

    # TensorLayer parameters (random stand-ins; module uses orthogonal/zeros,
    # which would make the test trivial).
    n_weights, n_biases = [], []
    for li in range(len(layer_dims) - 1):
        n_weights.append(0.5 * jax.random.normal(
            keys[li], (S_n, layer_dims[li], layer_dims[li + 1]), jnp.float32))
        n_biases.append(0.1 * jax.random.normal(
            keys[4 + li], (S_n, layer_dims[li + 1]), jnp.float32))

    # UnivariateOneHotEncodingLayer parameters.
    class_bias_list = [
        jax.random.normal(keys[8 + i], (num_classes_list[i], 1), jnp.float32)
        for i in range(len(num_classes_list))]
    global_bias_list = [
        0.1 * jax.random.normal(keys[11 + i], (1, 1), jnp.float32)
        for i in range(len(num_classes_list))]

    # Inputs: numerical columns ~ N(0,1); categorical columns hold integer
    # class indices stored as float (the torch module casts to int64 inside).
    x = jax.random.normal(keys[14], (B, D), jnp.float32)
    for j, ci in enumerate(cfeature_index_list):
        col = jax.random.randint(jax.random.fold_in(keys[15], j), (B,),
                                 0, num_classes_list[j])
        x = x.at[:, ci].set(col.astype(jnp.float32))

    out = pygamnet_forward(x, nfeature_index_list, cfeature_index_list,
                           n_weights, n_biases, class_bias_list,
                           global_bias_list, num_classes_list, activation)
    out = jax.block_until_ready(out)

    ref = _reference(x, nfeature_index_list, cfeature_index_list, n_weights,
                     n_biases, class_bias_list, global_bias_list,
                     num_classes_list, activation)
    assert out.shape == ref.shape, (out.shape, ref.shape)
    assert jnp.allclose(out, ref, atol=1e-5, rtol=1e-5), (out, ref)

    print("KERNEL_OK")
</pallas_src>

<mosaic_0001>
module attributes {stable_mosaic.version = 11 : i64} {
  func.func @_gam_kernel(%arg0: i32, %arg1: memref<16x128xf32, #tpu.memory_space<vmem>>, %arg2: memref<8x44xf32, #tpu.memory_space<vmem>>, %arg3: memref<8x13xf32, #tpu.memory_space<vmem>>, %arg4: memref<8x5xf32, #tpu.memory_space<vmem>>, %arg5: memref<8x1xf32, #tpu.memory_space<vmem>>, %arg6: memref<8x128xf32, #tpu.memory_space<vmem>>) attributes {dimension_semantics = [#tpu.dimension_semantics<parallel>], iteration_bounds = array<i64: 1>, scalar_prefetch = 0 : i64, scratch_operands = 0 : i64, tpu.core_type = #tpu.core_type<tc>, window_params = [{transform_indices = @transform_0, window_bounds = array<i64: 16, 128>}, {pipeline_mode = #tpu.pipeline_mode<synchronous>, transform_indices = @transform_1, window_bounds = array<i64: 8, 44>}, {pipeline_mode = #tpu.pipeline_mode<synchronous>, transform_indices = @transform_2, window_bounds = array<i64: 8, 13>}, {pipeline_mode = #tpu.pipeline_mode<synchronous>, transform_indices = @transform_3, window_bounds = array<i64: 8, 5>}, {pipeline_mode = #tpu.pipeline_mode<synchronous>, transform_indices = @transform_4, window_bounds = array<i64: 8, 1>}, {transform_indices = @transform_5, window_bounds = array<i64: 8, 128>}]} {
    %cst = arith.constant 0.000000e+00 : f32
    %0 = vector.broadcast %cst : f32 to vector<8x128xf32>
    %c0 = arith.constant 0 : index
    %c0_0 = arith.constant 0 : index
    %1 = vector.load %arg6[%c0, %c0_0] : memref<8x128xf32, #tpu.memory_space<vmem>>, vector<8x128xf32>
    tpu.vector_store %arg6[%c0, %c0_0], %0 {strides = array<i32>} : memref<8x128xf32, #tpu.memory_space<vmem>>, vector<8x128xf32>,
    %c0_1 = arith.constant 0 : index
    %c0_2 = arith.constant 0 : index
    %2 = vector.load %arg2[%c0_1, %c0_2] : memref<8x44xf32, #tpu.memory_space<vmem>>, vector<8x44xf32>
    %c0_3 = arith.constant 0 : index
    %c0_4 = arith.constant 0 : index
    %3 = vector.load %arg3[%c0_3, %c0_4] : memref<8x13xf32, #tpu.memory_space<vmem>>, vector<8x13xf32>
    %c0_5 = arith.constant 0 : index
    %c0_6 = arith.constant 0 : index
    %4 = vector.load %arg1[%c0_5, %c0_6] : memref<16x128xf32, #tpu.memory_space<vmem>>, vector<8x128xf32>
    %5 = vector.extract_strided_slice %2 {offsets = [0, 0], sizes = [8, 1], strides = [1, 1]} : vector<8x44xf32> to vector<8x1xf32>
    %6 = vector.broadcast %5 : vector<8x1xf32> to vector<8x128xf32>
    %7 = arith.mulf %6, %4 : vector<8x128xf32>
    %8 = vector.extract_strided_slice %3 {offsets = [0, 0], sizes = [8, 1], strides = [1, 1]} : vector<8x13xf32> to vector<8x1xf32>
    %9 = vector.broadcast %8 : vector<8x1xf32> to vector<8x128xf32>
    %10 = arith.addf %7, %9 : vector<8x128xf32>
    %cst_7 = arith.constant 0.000000e+00 : f32
    %11 = vector.broadcast %cst_7 : f32 to vector<8x128xf32>
    %12 = arith.maximumf %10, %11 : vector<8x128xf32>
    %13 = vector.extract_strided_slice %2 {offsets = [0, 1], sizes = [8, 1], strides = [1, 1]} : vector<8x44xf32> to vector<8x1xf32>
    %14 = vector.broadcast %13 : vector<8x1xf32> to vector<8x128xf32>
    %15 = arith.mulf %14, %4 : vector<8x128xf32>
    %16 = vector.extract_strided_slice %3 {offsets = [0, 1], sizes = [8, 1], strides = [1, 1]} : vector<8x13xf32> to vector<8x1xf32>
    %17 = vector.broadcast %16 : vector<8x1xf32> to vector<8x128xf32>
    %18 = arith.addf %15, %17 : vector<8x128xf32>
    %cst_8 = arith.constant 0.000000e+00 : f32
    %19 = vector.broadcast %cst_8 : f32 to vector<8x128xf32>
    %20 = arith.maximumf %18, %19 : vector<8x128xf32>
    %21 = vector.extract_strided_slice %2 {offsets = [0, 2], sizes = [8, 1], strides = [1, 1]} : vector<8x44xf32> to vector<8x1xf32>
    %22 = vector.broadcast %21 : vector<8x1xf32> to vector<8x128xf32>
    %23 = arith.mulf %22, %4 : vector<8x128xf32>
    %24 = vector.extract_strided_slice %3 {offsets = [0, 2], sizes = [8, 1], strides = [1, 1]} : vector<8x13xf32> to vector<8x1xf32>
    %25 = vector.broadcast %24 : vector<8x1xf32> to vector<8x128xf32>
    %26 = arith.addf %23, %25 : vector<8x128xf32>
    %cst_9 = arith.constant 0.000000e+00 : f32
    %27 = vector.broadcast %cst_9 : f32 to vector<8x128xf32>
    %28 = arith.maximumf %26, %27 : vector<8x128xf32>
    %29 = vector.extract_strided_slice %2 {offsets = [0, 3], sizes = [8, 1], strides = [1, 1]} : vector<8x44xf32> to vector<8x1xf32>
    %30 = vector.broadcast %29 : vector<8x1xf32> to vector<8x128xf32>
    %31 = arith.mulf %30, %4 : vector<8x128xf32>
    %32 = vector.extract_strided_slice %3 {offsets = [0, 3], sizes = [8, 1], strides = [1, 1]} : vector<8x13xf32> to vector<8x1xf32>
    %33 = vector.broadcast %32 : vector<8x1xf32> to vector<8x128xf32>
    %34 = arith.addf %31, %33 : vector<8x128xf32>
    %cst_10 = arith.constant 0.000000e+00 : f32
    %35 = vector.broadcast %cst_10 : f32 to vector<8x128xf32>
    %36 = arith.maximumf %34, %35 : vector<8x128xf32>
    %37 = vector.extract_strided_slice %2 {offsets = [0, 4], sizes = [8, 1], strides = [1, 1]} : vector<8x44xf32> to vector<8x1xf32>
    %38 = vector.broadcast %37 : vector<8x1xf32> to vector<8x128xf32>
    %39 = arith.mulf %38, %4 : vector<8x128xf32>
    %40 = vector.extract_strided_slice %3 {offsets = [0, 4], sizes = [8, 1], strides = [1, 1]} : vector<8x13xf32> to vector<8x1xf32>
    %41 = vector.broadcast %40 : vector<8x1xf32> to vector<8x128xf32>
    %42 = arith.addf %39, %41 : vector<8x128xf32>
    %cst_11 = arith.constant 0.000000e+00 : f32
    %43 = vector.broadcast %cst_11 : f32 to vector<8x128xf32>
    %44 = arith.maximumf %42, %43 : vector<8x128xf32>
    %45 = vector.extract_strided_slice %2 {offsets = [0, 5], sizes = [8, 1], strides = [1, 1]} : vector<8x44xf32> to vector<8x1xf32>
    %46 = vector.broadcast %45 : vector<8x1xf32> to vector<8x128xf32>
    %47 = arith.mulf %46, %4 : vector<8x128xf32>
    %48 = vector.extract_strided_slice %3 {offsets = [0, 5], sizes = [8, 1], strides = [1, 1]} : vector<8x13xf32> to vector<8x1xf32>
    %49 = vector.broadcast %48 : vector<8x1xf32> to vector<8x128xf32>
    %50 = arith.addf %47, %49 : vector<8x128xf32>
    %cst_12 = arith.constant 0.000000e+00 : f32
    %51 = vector.broadcast %cst_12 : f32 to vector<8x128xf32>
    %52 = arith.maximumf %50, %51 : vector<8x128xf32>
    %53 = vector.extract_strided_slice %2 {offsets = [0, 6], sizes = [8, 1], strides = [1, 1]} : vector<8x44xf32> to vector<8x1xf32>
    %54 = vector.broadcast %53 : vector<8x1xf32> to vector<8x128xf32>
    %55 = arith.mulf %54, %4 : vector<8x128xf32>
    %56 = vector.extract_strided_slice %3 {offsets = [0, 6], sizes = [8, 1], strides = [1, 1]} : vector<8x13xf32> to vector<8x1xf32>
    %57 = vector.broadcast %56 : vector<8x1xf32> to vector<8x128xf32>
    %58 = arith.addf %55, %57 : vector<8x128xf32>
    %cst_13 = arith.constant 0.000000e+00 : f32
    %59 = vector.broadcast %cst_13 : f32 to vector<8x128xf32>
    %60 = arith.maximumf %58, %59 : vector<8x128xf32>
    %61 = vector.extract_strided_slice %2 {offsets = [0, 7], sizes = [8, 1], strides = [1, 1]} : vector<8x44xf32> to vector<8x1xf32>
    %62 = vector.broadcast %61 : vector<8x1xf32> to vector<8x128xf32>
    %63 = arith.mulf %62, %4 : vector<8x128xf32>
    %64 = vector.extract_strided_slice %3 {offsets = [0, 7], sizes = [8, 1], strides = [1, 1]} : vector<8x13xf32> to vector<8x1xf32>
    %65 = vector.broadcast %64 : vector<8x1xf32> to vector<8x128xf32>
    %66 = arith.addf %63, %65 : vector<8x128xf32>
    %cst_14 = arith.constant 0.000000e+00 : f32
    %67 = vector.broadcast %cst_14 : f32 to vector<8x128xf32>
    %68 = arith.maximumf %66, %67 : vector<8x128xf32>
    %69 = vector.extract_strided_slice %2 {offsets = [0, 8], sizes = [8, 1], strides = [1, 1]} : vector<8x44xf32> to vector<8x1xf32>
    %70 = vector.broadcast %69 : vector<8x1xf32> to vector<8x128xf32>
    %71 = arith.mulf %70, %12 : vector<8x128xf32>
    %72 = vector.extract_strided_slice %2 {offsets = [0, 9], sizes = [8, 1], strides = [1, 1]} : vector<8x44xf32> to vector<8x1xf32>
    %73 = vector.broadcast %72 : vector<8x1xf32> to vector<8x128xf32>
    %74 = arith.mulf %73, %20 : vector<8x128xf32>
    %75 = arith.addf %71, %74 : vector<8x128xf32>
    %76 = vector.extract_strided_slice %2 {offsets = [0, 10], sizes = [8, 1], strides = [1, 1]} : vector<8x44xf32> to vector<8x1xf32>
    %77 = vector.broadcast %76 : vector<8x1xf32> to vector<8x128xf32>
    %78 = arith.mulf %77, %28 : vector<8x128xf32>
    %79 = arith.addf %75, %78 : vector<8x128xf32>
    %80 = vector.extract_strided_slice %2 {offsets = [0, 11], sizes = [8, 1], strides = [1, 1]} : vector<8x44xf32> to vector<8x1xf32>
    %81 = vector.broadcast %80 : vector<8x1xf32> to vector<8x128xf32>
    %82 = arith.mulf %81, %36 : vector<8x128xf32>
    %83 = arith.addf %79, %82 : vector<8x128xf32>
    %84 = vector.extract_strided_slice %2 {offsets = [0, 12], sizes = [8, 1], strides = [1, 1]} : vector<8x44xf32> to vector<8x1xf32>
    %85 = vector.broadcast %84 : vector<8x1xf32> to vector<8x128xf32>
    %86 = arith.mulf %85, %44 : vector<8x128xf32>
    %87 = arith.addf %83, %86 : vector<8x128xf32>
    %88 = vector.extract_strided_slice %2 {offsets = [0, 13], sizes = [8, 1], strides = [1, 1]} : vector<8x44xf32> to vector<8x1xf32>
    %89 = vector.broadcast %88 : vector<8x1xf32> to vector<8x128xf32>
    %90 = arith.mulf %89, %52 : vector<8x128xf32>
    %91 = arith.addf %87, %90 : vector<8x128xf32>
    %92 = vector.extract_strided_slice %2 {offsets = [0, 14], sizes = [8, 1], strides = [1, 1]} : vector<8x44xf32> to vector<8x1xf32>
    %93 = vector.broadcast %92 : vector<8x1xf32> to vector<8x128xf32>
    %94 = arith.mulf %93, %60 : vector<8x128xf32>
    %95 = arith.addf %91, %94 : vector<8x128xf32>
    %96 = vector.extract_strided_slice %2 {offsets = [0, 15], sizes = [8, 1], strides = [1, 1]} : vector<8x44xf32> to vector<8x1xf32>
    %97 = vector.broadcast %96 : vector<8x1xf32> to vector<8x128xf32>
    %98 = arith.mulf %97, %68 : vector<8x128xf32>
    %99 = arith.addf %95, %98 : vector<8x128xf32>
    %100 = vector.extract_strided_slice %3 {offsets = [0, 8], sizes = [8, 1], strides = [1, 1]} : vector<8x13xf32> to vector<8x1xf32>
    %101 = vector.broadcast %100 : vector<8x1xf32> to vector<8x128xf32>
    %102 = arith.addf %99, %101 : vector<8x128xf32>
    %cst_15 = arith.constant 0.000000e+00 : f32
    %103 = vector.broadcast %cst_15 : f32 to vector<8x128xf32>
    %104 = arith.maximumf %102, %103 : vector<8x128xf32>
    %105 = vector.extract_strided_slice %2 {offsets = [0, 16], sizes = [8, 1], strides = [1, 1]} : vector<8x44xf32> to vector<8x1xf32>
    %106 = vector.broadcast %105 : vector<8x1xf32> to vector<8x128xf32>
    %107 = arith.mulf %106, %12 : vector<8x128xf32>
    %108 = vector.extract_strided_slice %2 {offsets = [0, 17], sizes = [8, 1], strides = [1, 1]} : vector<8x44xf32> to vector<8x1xf32>
    %109 = vector.broadcast %108 : vector<8x1xf32> to vector<8x128xf32>
    %110 = arith.mulf %109, %20 : vector<8x128xf32>
    %111 = arith.addf %107, %110 : vector<8x128xf32>
    %112 = vector.extract_strided_slice %2 {offsets = [0, 18], sizes = [8, 1], strides = [1, 1]} : vector<8x44xf32> to vector<8x1xf32>
    %113 = vector.broadcast %112 : vector<8x1xf32> to vector<8x128xf32>
    %114 = arith.mulf %113, %28 : vector<8x128xf32>
    %115 = arith.addf %111, %114 : vector<8x128xf32>
    %116 = vector.extract_strided_slice %2 {offsets = [0, 19], sizes = [8, 1], strides = [1, 1]} : vector<8x44xf32> to vector<8x1xf32>
    %117 = vector.broadcast %116 : vector<8x1xf32> to vector<8x128xf32>
    %118 = arith.mulf %117, %36 : vector<8x128xf32>
    %119 = arith.addf %115, %118 : vector<8x128xf32>
    %120 = vector.extract_strided_slice %2 {offsets = [0, 20], sizes = [8, 1], strides = [1, 1]} : vector<8x44xf32> to vector<8x1xf32>
    %121 = vector.broadcast %120 : vector<8x1xf32> to vector<8x128xf32>
    %122 = arith.mulf %121, %44 : vector<8x128xf32>
    %123 = arith.addf %119, %122 : vector<8x128xf32>
    %124 = vector.extract_strided_slice %2 {offsets = [0, 21], sizes = [8, 1], strides = [1, 1]} : vector<8x44xf32> to vector<8x1xf32>
    %125 = vector.broadcast %124 : vector<8x1xf32> to vector<8x128xf32>
    %126 = arith.mulf %125, %52 : vector<8x128xf32>
    %127 = arith.addf %123, %126 : vector<8x128xf32>
    %128 = vector.extract_strided_slice %2 {offsets = [0, 22], sizes = [8, 1], strides = [1, 1]} : vector<8x44xf32> to vector<8x1xf32>
    %129 = vector.broadcast %128 : vector<8x1xf32> to vector<8x128xf32>
    %130 = arith.mulf %129, %60 : vector<8x128xf32>
    %131 = arith.addf %127, %130 : vector<8x128xf32>
    %132 = vector.extract_strided_slice %2 {offsets = [0, 23], sizes = [8, 1], strides = [1, 1]} : vector<8x44xf32> to vector<8x1xf32>
    %133 = vector.broadcast %132 : vector<8x1xf32> to vector<8x128xf32>
    %134 = arith.mulf %133, %68 : vector<8x128xf32>
    %135 = arith.addf %131, %134 : vector<8x128xf32>
    %136 = vector.extract_strided_slice %3 {offsets = [0, 9], sizes = [8, 1], strides = [1, 1]} : vector<8x13xf32> to vector<8x1xf32>
    %137 = vector.broadcast %136 : vector<8x1xf32> to vector<8x128xf32>
    %138 = arith.addf %135, %137 : vector<8x128xf32>
    %cst_16 = arith.constant 0.000000e+00 : f32
    %139 = vector.broadcast %cst_16 : f32 to vector<8x128xf32>
    %140 = arith.maximumf %138, %139 : vector<8x128xf32>
    %141 = vector.extract_strided_slice %2 {offsets = [0, 24], sizes = [8, 1], strides = [1, 1]} : vector<8x44xf32> to vector<8x1xf32>
    %142 = vector.broadcast %141 : vector<8x1xf32> to vector<8x128xf32>
    %143 = arith.mulf %142, %12 : vector<8x128xf32>
    %144 = vector.extract_strided_slice %2 {offsets = [0, 25], sizes = [8, 1], strides = [1, 1]} : vector<8x44xf32> to vector<8x1xf32>
    %145 = vector.broadcast %144 : vector<8x1xf32> to vector<8x128xf32>
    %146 = arith.mulf %145, %20 : vector<8x128xf32>
    %147 = arith.addf %143, %146 : vector<8x128xf32>
    %148 = vector.extract_strided_slice %2 {offsets = [0, 26], sizes = [8, 1], strides = [1, 1]} : vector<8x44xf32> to vector<8x1xf32>
    %149 = vector.broadcast %148 : vector<8x1xf32> to vector<8x128xf32>
    %150 = arith.mulf %149, %28 : vector<8x128xf32>
    %151 = arith.addf %147, %150 : vector<8x128xf32>
    %152 = vector.extract_strided_slice %2 {offsets = [0, 27], sizes = [8, 1], strides = [1, 1]} : vector<8x44xf32> to vector<8x1xf32>
    %153 = vector.broadcast %152 : vector<8x1xf32> to vector<8x128xf32>
    %154 = arith.mulf %153, %36 : vector<8x128xf32>
    %155 = arith.addf %151, %154 : vector<8x128xf32>
    %156 = vector.extract_strided_slice %2 {offsets = [0, 28], sizes = [8, 1], strides = [1, 1]} : vector<8x44xf32> to vector<8x1xf32>
    %157 = vector.broadcast %156 : vector<8x1xf32> to vector<8x128xf32>
    %158 = arith.mulf %157, %44 : vector<8x128xf32>
    %159 = arith.addf %155, %158 : vector<8x128xf32>
    %160 = vector.extract_strided_slice %2 {offsets = [0, 29], sizes = [8, 1], strides = [1, 1]} : vector<8x44xf32> to vector<8x1xf32>
    %161 = vector.broadcast %160 : vector<8x1xf32> to vector<8x128xf32>
    %162 = arith.mulf %161, %52 : vector<8x128xf32>
    %163 = arith.addf %159, %162 : vector<8x128xf32>
    %164 = vector.extract_strided_slice %2 {offsets = [0, 30], sizes = [8, 1], strides = [1, 1]} : vector<8x44xf32> to vector<8x1xf32>
    %165 = vector.broadcast %164 : vector<8x1xf32> to vector<8x128xf32>
    %166 = arith.mulf %165, %60 : vector<8x128xf32>
    %167 = arith.addf %163, %166 : vector<8x128xf32>
    %168 = vector.extract_strided_slice %2 {offsets = [0, 31], sizes = [8, 1], strides = [1, 1]} : vector<8x44xf32> to vector<8x1xf32>
    %169 = vector.broadcast %168 : vector<8x1xf32> to vector<8x128xf32>
    %170 = arith.mulf %169, %68 : vector<8x128xf32>
    %171 = arith.addf %167, %170 : vector<8x128xf32>
    %172 = vector.extract_strided_slice %3 {offsets = [0, 10], sizes = [8, 1], strides = [1, 1]} : vector<8x13xf32> to vector<8x1xf32>
    %173 = vector.broadcast %172 : vector<8x1xf32> to vector<8x128xf32>
    %174 = arith.addf %171, %173 : vector<8x128xf32>
    %cst_17 = arith.constant 0.000000e+00 : f32
    %175 = vector.broadcast %cst_17 : f32 to vector<8x128xf32>
    %176 = arith.maximumf %174, %175 : vector<8x128xf32>
    %177 = vector.extract_strided_slice %2 {offsets = [0, 32], sizes = [8, 1], strides = [1, 1]} : vector<8x44xf32> to vector<8x1xf32>
    %178 = vector.broadcast %177 : vector<8x1xf32> to vector<8x128xf32>
    %179 = arith.mulf %178, %12 : vector<8x128xf32>
    %180 = vector.extract_strided_slice %2 {offsets = [0, 33], sizes = [8, 1], strides = [1, 1]} : vector<8x44xf32> to vector<8x1xf32>
    %181 = vector.broadcast %180 : vector<8x1xf32> to vector<8x128xf32>
    %182 = arith.mulf %181, %20 : vector<8x128xf32>
    %183 = arith.addf %179, %182 : vector<8x128xf32>
    %184 = vector.extract_strided_slice %2 {offsets = [0, 34], sizes = [8, 1], strides = [1, 1]} : vector<8x44xf32> to vector<8x1xf32>
    %185 = vector.broadcast %184 : vector<8x1xf32> to vector<8x128xf32>
    %186 = arith.mulf %185, %28 : vector<8x128xf32>
    %187 = arith.addf %183, %186 : vector<8x128xf32>
    %188 = vector.extract_strided_slice %2 {offsets = [0, 35], sizes = [8, 1], strides = [1, 1]} : vector<8x44xf32> to vector<8x1xf32>
    %189 = vector.broadcast %188 : vector<8x1xf32> to vector<8x128xf32>
    %190 = arith.mulf %189, %36 : vector<8x128xf32>
    %191 = arith.addf %187, %190 : vector<8x128xf32>
    %192 = vector.extract_strided_slice %2 {offsets = [0, 36], sizes = [8, 1], strides = [1, 1]} : vector<8x44xf32> to vector<8x1xf32>
    %193 = vector.broadcast %192 : vector<8x1xf32> to vector<8x128xf32>
    %194 = arith.mulf %193, %44 : vector<8x128xf32>
    %195 = arith.addf %191, %194 : vector<8x128xf32>
    %196 = vector.extract_strided_slice %2 {offsets = [0, 37], sizes = [8, 1], strides = [1, 1]} : vector<8x44xf32> to vector<8x1xf32>
    %197 = vector.broadcast %196 : vector<8x1xf32> to vector<8x128xf32>
    %198 = arith.mulf %197, %52 : vector<8x128xf32>
    %199 = arith.addf %195, %198 : vector<8x128xf32>
    %200 = vector.extract_strided_slice %2 {offsets = [0, 38], sizes = [8, 1], strides = [1, 1]} : vector<8x44xf32> to vector<8x1xf32>
    %201 = vector.broadcast %200 : vector<8x1xf32> to vector<8x128xf32>
    %202 = arith.mulf %201, %60 : vector<8x128xf32>
    %203 = arith.addf %199, %202 : vector<8x128xf32>
    %204 = vector.extract_strided_slice %2 {offsets = [0, 39], sizes = [8, 1], strides = [1, 1]} : vector<8x44xf32> to vector<8x1xf32>
    %205 = vector.broadcast %204 : vector<8x1xf32> to vector<8x128xf32>
    %206 = arith.mulf %205, %68 : vector<8x128xf32>
    %207 = arith.addf %203, %206 : vector<8x128xf32>
    %208 = vector.extract_strided_slice %3 {offsets = [0, 11], sizes = [8, 1], strides = [1, 1]} : vector<8x13xf32> to vector<8x1xf32>
    %209 = vector.broadcast %208 : vector<8x1xf32> to vector<8x128xf32>
    %210 = arith.addf %207, %209 : vector<8x128xf32>
    %cst_18 = arith.constant 0.000000e+00 : f32
    %211 = vector.broadcast %cst_18 : f32 to vector<8x128xf32>
    %212 = arith.maximumf %210, %211 : vector<8x128xf32>
    %213 = vector.extract_strided_slice %2 {offsets = [0, 40], sizes = [8, 1], strides = [1, 1]} : vector<8x44xf32> to vector<8x1xf32>
    %214 = vector.broadcast %213 : vector<8x1xf32> to vector<8x128xf32>
    %215 = arith.mulf %214, %104 : vector<8x128xf32>
    %216 = vector.extract_strided_slice %2 {offsets = [0, 41], sizes = [8, 1], strides = [1, 1]} : vector<8x44xf32> to vector<8x1xf32>
    %217 = vector.broadcast %216 : vector<8x1xf32> to vector<8x128xf32>
    %218 = arith.mulf %217, %140 : vector<8x128xf32>
    %219 = arith.addf %215, %218 : vector<8x128xf32>
    %220 = vector.extract_strided_slice %2 {offsets = [0, 42], sizes = [8, 1], strides = [1, 1]} : vector<8x44xf32> to vector<8x1xf32>
    %221 = vector.broadcast %220 : vector<8x1xf32> to vector<8x128xf32>
    %222 = arith.mulf %221, %176 : vector<8x128xf32>
    %223 = arith.addf %219, %222 : vector<8x128xf32>
    %224 = vector.extract_strided_slice %2 {offsets = [0, 43], sizes = [8, 1], strides = [1, 1]} : vector<8x44xf32> to vector<8x1xf32>
    %225 = vector.broadcast %224 : vector<8x1xf32> to vector<8x128xf32>
    %226 = arith.mulf %225, %212 : vector<8x128xf32>
    %227 = arith.addf %223, %226 : vector<8x128xf32>
    %228 = vector.extract_strided_slice %3 {offsets = [0, 12], sizes = [8, 1], strides = [1, 1]} : vector<8x13xf32> to vector<8x1xf32>
    %229 = vector.broadcast %228 : vector<8x1xf32> to vector<8x128xf32>
    %230 = arith.addf %227, %229 : vector<8x128xf32>
    %231 = vector.extract_strided_slice %230 {offsets = [0, 0], sizes = [1, 128], strides = [1, 1]} : vector<8x128xf32> to vector<1x128xf32>
    %c0_19 = arith.constant 0 : index
    %c0_20 = arith.constant 0 : index
    %232 = vector.load %arg6[%c0_19, %c0_20] : memref<8x128xf32, #tpu.memory_space<vmem>>, vector<1x128xf32>
    tpu.vector_store %arg6[%c0_19, %c0_20], %231 {strides = array<i32>} : memref<8x128xf32, #tpu.memory_space<vmem>>, vector<1x128xf32>,
    %233 = vector.extract_strided_slice %230 {offsets = [1, 0], sizes = [1, 128], strides = [1, 1]} : vector<8x128xf32> to vector<1x128xf32>
    %c2 = arith.constant 2 : index
    %c0_21 = arith.constant 0 : index
    %234 = vector.load %arg6[%c2, %c0_21] : memref<8x128xf32, #tpu.memory_space<vmem>>, vector<1x128xf32>
    tpu.vector_store %arg6[%c2, %c0_21], %233 {strides = array<i32>} : memref<8x128xf32, #tpu.memory_space<vmem>>, vector<1x128xf32>,
    %235 = vector.extract_strided_slice %230 {offsets = [2, 0], sizes = [1, 128], strides = [1, 1]} : vector<8x128xf32> to vector<1x128xf32>
    %c4 = arith.constant 4 : index
    %c0_22 = arith.constant 0 : index
    %236 = vector.load %arg6[%c4, %c0_22] : memref<8x128xf32, #tpu.memory_space<vmem>>, vector<1x128xf32>
    tpu.vector_store %arg6[%c4, %c0_22], %235 {strides = array<i32>} : memref<8x128xf32, #tpu.memory_space<vmem>>, vector<1x128xf32>,
    %237 = vector.extract_strided_slice %230 {offsets = [3, 0], sizes = [1, 128], strides = [1, 1]} : vector<8x128xf32> to vector<1x128xf32>
    %c5 = arith.constant 5 : index
    %c0_23 = arith.constant 0 : index
    %238 = vector.load %arg6[%c5, %c0_23] : memref<8x128xf32, #tpu.memory_space<vmem>>, vector<1x128xf32>
    tpu.vector_store %arg6[%c5, %c0_23], %237 {strides = array<i32>} : memref<8x128xf32, #tpu.memory_space<vmem>>, vector<1x128xf32>,
    %c0_24 = arith.constant 0 : index
    %c0_25 = arith.constant 0 : index
    %239 = vector.load %arg4[%c0_24, %c0_25] : memref<8x5xf32, #tpu.memory_space<vmem>>, vector<8x5xf32>
    %c8 = arith.constant 8 : index
    %c0_26 = arith.constant 0 : index
    %240 = vector.load %arg1[%c8, %c0_26] : memref<16x128xf32, #tpu.memory_space<vmem>>, vector<8x128xf32>
    %241 = arith.fptosi %240 : vector<8x128xf32> to vector<8x128xi32>
    %c0_27 = arith.constant 0 : index
    %c0_28 = arith.constant 0 : index
    %242 = vector.load %arg5[%c0_27, %c0_28] : memref<8x1xf32, #tpu.memory_space<vmem>>, vector<8x1xf32>
    %243 = vector.shape_cast %242 : vector<8x1xf32> to vector<8x1xf32>
    %244 = vector.broadcast %243 : vector<8x1xf32> to vector<8x128xf32>
    %c0_i32 = arith.constant 0 : i32
    %245 = vector.broadcast %c0_i32 : i32 to vector<8x128xi32>
    %246 = arith.cmpi eq, %241, %245 : vector<8x128xi32>
    %247 = vector.extract_strided_slice %239 {offsets = [0, 0], sizes = [8, 1], strides = [1, 1]} : vector<8x5xf32> to vector<8x1xf32>
    %248 = vector.shape_cast %247 : vector<8x1xf32> to vector<8x1xf32>
    %249 = vector.broadcast %248 : vector<8x1xf32> to vector<8x128xf32>
    %250 = arith.select %246, %249, %244 : vector<8x128xi1>, vector<8x128xf32>
    %c1_i32 = arith.constant 1 : i32
    %251 = vector.broadcast %c1_i32 : i32 to vector<8x128xi32>
    %252 = arith.cmpi eq, %241, %251 : vector<8x128xi32>
    %253 = vector.extract_strided_slice %239 {offsets = [0, 1], sizes = [8, 1], strides = [1, 1]} : vector<8x5xf32> to vector<8x1xf32>
    %254 = vector.shape_cast %253 : vector<8x1xf32> to vector<8x1xf32>
    %255 = vector.broadcast %254 : vector<8x1xf32> to vector<8x128xf32>
    %256 = arith.select %252, %255, %250 : vector<8x128xi1>, vector<8x128xf32>
    %c2_i32 = arith.constant 2 : i32
    %257 = vector.broadcast %c2_i32 : i32 to vector<8x128xi32>
    %258 = arith.cmpi eq, %241, %257 : vector<8x128xi32>
    %259 = vector.extract_strided_slice %239 {offsets = [0, 2], sizes = [8, 1], strides = [1, 1]} : vector<8x5xf32> to vector<8x1xf32>
    %260 = vector.shape_cast %259 : vector<8x1xf32> to vector<8x1xf32>
    %261 = vector.broadcast %260 : vector<8x1xf32> to vector<8x128xf32>
    %262 = arith.select %258, %261, %256 : vector<8x128xi1>, vector<8x128xf32>
    %c3_i32 = arith.constant 3 : i32
    %263 = vector.broadcast %c3_i32 : i32 to vector<8x128xi32>
    %264 = arith.cmpi eq, %241, %263 : vector<8x128xi32>
    %265 = vector.extract_strided_slice %239 {offsets = [0, 3], sizes = [8, 1], strides = [1, 1]} : vector<8x5xf32> to vector<8x1xf32>
    %266 = vector.shape_cast %265 : vector<8x1xf32> to vector<8x1xf32>
    %267 = vector.broadcast %266 : vector<8x1xf32> to vector<8x128xf32>
    %268 = arith.select %264, %267, %262 : vector<8x128xi1>, vector<8x128xf32>
    %c4_i32 = arith.constant 4 : i32
    %269 = vector.broadcast %c4_i32 : i32 to vector<8x128xi32>
    %270 = arith.cmpi eq, %241, %269 : vector<8x128xi32>
    %271 = vector.extract_strided_slice %239 {offsets = [0, 4], sizes = [8, 1], strides = [1, 1]} : vector<8x5xf32> to vector<8x1xf32>
    %272 = vector.shape_cast %271 : vector<8x1xf32> to vector<8x1xf32>
    %273 = vector.broadcast %272 : vector<8x1xf32> to vector<8x128xf32>
    %274 = arith.select %270, %273, %268 : vector<8x128xi1>, vector<8x128xf32>
    %275 = vector.extract_strided_slice %274 {offsets = [0, 0], sizes = [1, 128], strides = [1, 1]} : vector<8x128xf32> to vector<1x128xf32>
    %c1 = arith.constant 1 : index
    %c0_29 = arith.constant 0 : index
    %276 = vector.load %arg6[%c1, %c0_29] : memref<8x128xf32, #tpu.memory_space<vmem>>, vector<1x128xf32>
    tpu.vector_store %arg6[%c1, %c0_29], %275 {strides = array<i32>} : memref<8x128xf32, #tpu.memory_space<vmem>>, vector<1x128xf32>,
    %277 = vector.extract_strided_slice %274 {offsets = [1, 0], sizes = [1, 128], strides = [1, 1]} : vector<8x128xf32> to vector<1x128xf32>
    %c3 = arith.constant 3 : index
    %c0_30 = arith.constant 0 : index
    %278 = vector.load %arg6[%c3, %c0_30] : memref<8x128xf32, #tpu.memory_space<vmem>>, vector<1x128xf32>
    tpu.vector_store %arg6[%c3, %c0_30], %277 {strides = array<i32>} : memref<8x128xf32, #tpu.memory_space<vmem>>, vector<1x128xf32>,
    %279 = vector.extract_strided_slice %274 {offsets = [2, 0], sizes = [1, 128], strides = [1, 1]} : vector<8x128xf32> to vector<1x128xf32>
    %c6 = arith.constant 6 : index
    %c0_31 = arith.constant 0 : index
    %280 = vector.load %arg6[%c6, %c0_31] : memref<8x128xf32, #tpu.memory_space<vmem>>, vector<1x128xf32>
    tpu.vector_store %arg6[%c6, %c0_31], %279 {strides = array<i32>} : memref<8x128xf32, #tpu.memory_space<vmem>>, vector<1x128xf32>,
    return
  }
  func.func @transform_0(%arg0: i32) -> (i32, i32) {
    %c0_i32 = arith.constant 0 : i32
    %c0_i32_0 = arith.constant 0 : i32
    return %c0_i32, %arg0 : i32, i32
  }
  func.func @transform_1(%arg0: i32) -> (i32, i32) {
    %c0_i32 = arith.constant 0 : i32
    %c0_i32_0 = arith.constant 0 : i32
    %c0_i32_1 = arith.constant 0 : i32
    return %c0_i32, %c0_i32_0 : i32, i32
  }
  func.func @transform_2(%arg0: i32) -> (i32, i32) {
    %c0_i32 = arith.constant 0 : i32
    %c0_i32_0 = arith.constant 0 : i32
    %c0_i32_1 = arith.constant 0 : i32
    return %c0_i32, %c0_i32_0 : i32, i32
  }
  func.func @transform_3(%arg0: i32) -> (i32, i32) {
    %c0_i32 = arith.constant 0 : i32
    %c0_i32_0 = arith.constant 0 : i32
    %c0_i32_1 = arith.constant 0 : i32
    return %c0_i32, %c0_i32_0 : i32, i32
  }
  func.func @transform_4(%arg0: i32) -> (i32, i32) {
    %c0_i32 = arith.constant 0 : i32
    %c0_i32_0 = arith.constant 0 : i32
    %c0_i32_1 = arith.constant 0 : i32
    return %c0_i32, %c0_i32_0 : i32, i32
  }
  func.func @transform_5(%arg0: i32) -> (i32, i32) {
    %c0_i32 = arith.constant 0 : i32
    %c0_i32_0 = arith.constant 0 : i32
    return %c0_i32, %arg0 : i32, i32
  }
}

</mosaic_0001>

<bundles_post_ra>
// kernel: tpu_custom_call.1
= control target key start
LH: loop header
LB: loop body
LE: loop exit
PB: predicated region body
PF: predicated region fallthrough
CT: control target
= control target key end

     0   :  { %10 = vsyncpa [#allocation3], 0  ;;  %s902_s0 = inlined_call_operand.hbm [shape: f32[16,128], index: 0, kind: input, shape index: {}]   ;;  %s903_s1 = inlined_call_operand.vmem [shape: f32[8,44], index: 1, kind: input, shape index: {}]   ;;  %s904_s2 = inlined_call_operand.vmem [shape: f32[8,13], index: 2, kind: input, shape index: {}]   ;;  %s905_s3 = inlined_call_operand.hbm [shape: f32[8,5], index: 3, kind: input, shape index: {}]   ;;  %s906_s4 = inlined_call_operand.vmem [shape: f32[8,1], index: 4, kind: input, shape index: {}]   ;;  %s907_s5 = inlined_call_operand.hbm [shape: f32[8,128], index: 5, kind: output, shape index: {}]  }
   0x1   :  { %11 = vsyncpa [#allocation6], 0 }
   0x2   :  { %12 = vsyncpa [#allocation4], 0  ;;  %s627_s18 = smov [#allocation2]   ;;  %s555_s22 = scalar_lea.hbm %s902_s0, 256 }
   0x3   :  { %s18_s19 = sshll.u32 %s627_s18, 4  ;;  %p556_p0 = scmp.ne.s32.totalorder %s902_s0, %s555_s22  ;;  %s19_s19 = int_to_ptr.vmem [resolvable:$true] %s18_s19 }
   0x4   :  { %p559_p1 = scmp.lt.u32.totalorder %s555_s22, %s902_s0 }
   0x6   :  { %p561_p2 = pnand %p559_p1, %p556_p0 }
   0x8   :  { %564 = shalt.err (!%p561_p2)
}
   0x9   :  { %s565_s27 = scalar_lea.vmem %s19_s19, 256  ;;  %p570_p4 = scmp.lt.s32.totalorder %s19_s19, %s19_s19 }
   0xa   :  { %p566_p3 = scmp.ne.s32.totalorder %s19_s19, %s565_s27  ;;  %p571_p5 = scmp.lt.s32.totalorder %s565_s27, %s565_s27 }
   0xc   :  { %p572_p6 = por %p571_p5, %p570_p4 }
   0xe   :  { %p573_p7 = pnand %p572_p6, %p566_p3 }
  0x10   :  { %576 = shalt.err (!%p573_p7)
}
  0x11   :  { %s628_s28 = smov 128   ;;  %s629_s29 = smov 8  }
  0x12   :  { %24 = dma.hbm_to_vmem [thread:$0]  %s902_s0, 256, %s19_s19, [#allocation3], %s628_s28, %s628_s28, %s629_s29  }
  0x13   :  { %s630_s7 = smov [#allocation5]   ;;  %s577_s11 = scalar_lea.hbm %s905_s3, 128 }
  0x14   :  { %s35_s8 = sshll.u32 %s630_s7, 4  ;;  %p578_p8 = scmp.ne.s32.totalorder %s905_s3, %s577_s11  ;;  %s36_s8 = int_to_ptr.vmem [resolvable:$true] %s35_s8 }
  0x15   :  { %p581_p9 = scmp.lt.u32.totalorder %s577_s11, %s905_s3 }
  0x17   :  { %p583_p10 = pnand %p581_p9, %p578_p8 }
  0x19   :  { %586 = shalt.err (!%p583_p10)
}
  0x1a   :  { %s587_s16 = scalar_lea.vmem %s36_s8, 128  ;;  %p592_p12 = scmp.lt.s32.totalorder %s36_s8, %s36_s8 }
  0x1b   :  { %p588_p11 = scmp.ne.s32.totalorder %s36_s8, %s587_s16  ;;  %p593_p13 = scmp.lt.s32.totalorder %s587_s16, %s587_s16 }
  0x1d   :  { %p594_p0 = por %p593_p13, %p592_p12 }
  0x1f   :  { %p595_p1 = pnand %p594_p0, %p588_p11 }
  0x21   :  { %598 = shalt.err (!%p595_p1)
}
  0x22   :  { %38 = dma.hbm_to_vmem [thread:$0]  %s905_s3, 128, %s36_s8, [#allocation6]  }
  0x23   :  { %621 = dma.done.wait [#allocation3], 256  }
  0x24   :  { %622 = vsyncadd [#allocation3], 4294967040 }
  0x25   :  { %623 = dma.done.wait [#allocation6], 128  }
  0x26   :  { %624 = vsyncadd [#allocation6], 4294967168  ;;  %v631_v0 = vmov 1   ;;  %v632_v1 = vmov 0   ;;  %v736_v2 = vld [vmem:[%s903_s1] sm:$0xff]  ;;  %v633_v4 = vmov 2  }
  0x27   :  { %497 = vset.pattern.permute.xlu1 %v631_v0  ;;  %496 = vset.pattern.permute.xlu0 %v632_v1  ;;  %v743_v3 = vld [vmem:[%s904_s2] sm:$0xff]  ;;  %v634_v5 = vmov 3   ;;  %v635_v6 = vmov 4   ;;  %v636_v7 = vmov 5   ;;  %v637_v8 = vmov 6   ;;  %v792_v34 = vld [vmem:[#allocation5] sm:$0xff] }
  0x28   :  { %65 = vperm.xlu1 %497, %v736_v2   ;;  %53 = vperm.xlu0 %496, %v736_v2   ;;  %v638_v9 = vmov 8   ;;  %v639_v10 = vmov 11   ;;  %v640_v11 = vmov 7   ;;  %v641_v12 = vmov 14   ;;  %v807_v40 = vld [vmem:[#allocation2] sm:$0xff] }
  0x29   :  { %v642_v13 = vmov 16   ;;  %v643_v14 = vmov 9   ;;  %v644_v15 = vmov 19   ;;  %v645_v16 = vmov 10  }
  0x2a   :  { %v646_v17 = vmov 22   ;;  %v647_v18 = vmov 12   ;;  %v648_v19 = vmov 24   ;;  %v649_v20 = vmov 13  }
  0x2b   :  { %v650_v21 = vmov 27   ;;  %v651_v22 = vmov 15   ;;  %v652_v23 = vmov 32   ;;  %v653_v24 = vmov 35  }
  0x2c   :  { %70 = vperm.xlu1 %497, %v743_v3   ;;  %59 = vperm.xlu0 %496, %v743_v3   ;;  %v654_v25 = vmov 17   ;;  %v655_v26 = vmov 37   ;;  %v656_v27 = vmov 18   ;;  %v657_v28 = vmov 39  }
  0x2d   :  { %v658_v29 = vmov 20   ;;  %v659_v30 = vmov 40   ;;  %v660_v31 = vmov 21   ;;  %v661_v32 = vmov 43  }
  0x2e   :  { %v662_v33 = vmov 23   ;;  %v663_v35 = vmov 25   ;;  %v664_v36 = vmov 26   ;;  %v665_v37 = vmov 28  }
  0x2f   :  { %v666_v38 = vmov 29   ;;  %v667_v39 = vmov 33   ;;  %v668_v43 = vmov 34   ;;  %v669_v46 = vmov 36  }
  0x30   :  { %499 = vset.pattern.permute.xlu1 %v633_v4  ;;  %498 = vset.pattern.permute.xlu0 %v633_v4  ;;  %v670_v49 = vmov 30   ;;  %v671_v51 = vmov 31   ;;  %v672_v57 = vmov 38  }
  0x31   :  { %81 = vperm.xlu1 %499, %v743_v3   ;;  %76 = vperm.xlu0 %498, %v736_v2  }
  0x35   :  { %500 = vset.pattern.permute.xlu1 %v634_v5  ;;  %501 = vset.pattern.permute.xlu0 %v634_v5 }
  0x36   :  { %87 = vperm.xlu1 %500, %v736_v2   ;;  %92 = vperm.xlu0 %501, %v743_v3  }
  0x3a   :  { %502 = vset.pattern.permute.xlu1 %v635_v6  ;;  %503 = vset.pattern.permute.xlu0 %v636_v7 }
  0x3b   :  { %98 = vperm.xlu1 %502, %v736_v2   ;;  %109 = vperm.xlu0 %503, %v736_v2  }
  0x3f   :  { %103 = vperm.xlu1 %502, %v743_v3   ;;  %506 = vset.pattern.permute.xlu0 %v637_v8 }
  0x40   :  { %125 = vperm.xlu0 %506, %v743_v3  }
  0x43   :  { %504 = vset.pattern.permute.xlu1 %v636_v7 }
  0x44   :  { %114 = vperm.xlu1 %504, %v743_v3   ;;  %508 = vset.pattern.permute.xlu0 %v638_v9 }
  0x45   :  { %142 = vperm.xlu0 %508, %v736_v2  }
  0x48   :  { %505 = vset.pattern.permute.xlu1 %v637_v8 }
  0x49   :  { %120 = vperm.xlu1 %505, %v736_v2   ;;  %511 = vset.pattern.permute.xlu0 %v639_v10 }
  0x4a   :  { %159 = vperm.xlu0 %511, %v736_v2  }
  0x4d   :  { %507 = vset.pattern.permute.xlu1 %v640_v11 }
  0x4e   :  { %131 = vperm.xlu1 %507, %v736_v2   ;;  %514 = vset.pattern.permute.xlu0 %v641_v12 }
  0x4f   :  { %177 = vperm.xlu0 %514, %v736_v2  }
  0x52   :  { %136 = vperm.xlu1 %507, %v743_v3  }
  0x53   :  { %517 = vset.pattern.permute.xlu0 %v642_v13 }
  0x54   :  { %195 = vperm.xlu0 %517, %v736_v2  }
  0x56   :  { %509 = vset.pattern.permute.xlu1 %v643_v14 }
  0x57   :  { %147 = vperm.xlu1 %509, %v736_v2  }
  0x58   :  { %520 = vset.pattern.permute.xlu0 %v644_v15 }
  0x59   :  { %212 = vperm.xlu0 %520, %v736_v2  }
  0x5b   :  { %510 = vset.pattern.permute.xlu1 %v645_v16 }
  0x5c   :  { %153 = vperm.xlu1 %510, %v736_v2  }
  0x5d   :  { %523 = vset.pattern.permute.xlu0 %v646_v17 }
  0x5e   :  { %230 = vperm.xlu0 %523, %v736_v2  }
  0x60   :  { %512 = vset.pattern.permute.xlu1 %v647_v18 }
  0x61   :  { %165 = vperm.xlu1 %512, %v736_v2  }
  0x62   :  { %526 = vset.pattern.permute.xlu0 %v648_v19 }
  0x63   :  { %248 = vperm.xlu0 %526, %v736_v2  }
  0x65   :  { %513 = vset.pattern.permute.xlu1 %v649_v20 }
  0x66   :  { %171 = vperm.xlu1 %513, %v736_v2  }
  0x67   :  { %529 = vset.pattern.permute.xlu0 %v650_v21  ;;  %v388_v21 = vld [vmem:[%s906_s4] sm:$0xff]  ;;  %s676_s4 = smov [#allocation7]  }
  0x68   :  { %265 = vperm.xlu0 %529, %v736_v2   ;;  %s434_s21 = sshll.u32 %s676_s4, 4  ;;  %s435_s21 = int_to_ptr.vmem [resolvable:$true] %s434_s21 }
  0x69   :  { %s599_s22 = scalar_lea.vmem %s435_s21, 128  ;;  %p604_p3 = scmp.lt.s32.totalorder %s435_s21, %s435_s21 }
  0x6a   :  { %515 = vset.pattern.permute.xlu1 %v651_v22  ;;  %p600_p2 = scmp.ne.s32.totalorder %s435_s21, %s599_s22  ;;  %p605_p4 = scmp.lt.s32.totalorder %s599_s22, %s599_s22 }
  0x6b   :  { %183 = vperm.xlu1 %515, %v736_v2  }
  0x6c   :  { %532 = vset.pattern.permute.xlu0 %v652_v23  ;;  %p606_p5 = por %p605_p4, %p604_p3 }
  0x6d   :  { %301 = vperm.xlu0 %532, %v736_v2  }
  0x6e   :  { %p607_p6 = pnand %p606_p5, %p600_p2 }
  0x6f   :  { %516 = vset.pattern.permute.xlu1 %v638_v9 }
  0x70   :  { %189 = vperm.xlu1 %516, %v743_v3  }
  0x71   :  { %535 = vset.pattern.permute.xlu0 %v653_v24 }
  0x72   :  { %318 = vperm.xlu0 %535, %v736_v2  }
  0x74   :  { %518 = vset.pattern.permute.xlu1 %v654_v25 }
  0x75   :  { %200 = vperm.xlu1 %518, %v736_v2  }
  0x76   :  { %538 = vset.pattern.permute.xlu0 %v655_v26 }
  0x77   :  { %330 = vperm.xlu0 %538, %v736_v2  }
  0x79   :  { %519 = vset.pattern.permute.xlu1 %v656_v27 }
  0x7a   :  { %206 = vperm.xlu1 %519, %v736_v2  }
  0x7b   :  { %541 = vset.pattern.permute.xlu0 %v657_v28 }
  0x7c   :  { %342 = vperm.xlu0 %541, %v736_v2  }
  0x7e   :  { %521 = vset.pattern.permute.xlu1 %v658_v29 }
  0x7f   :  { %218 = vperm.xlu1 %521, %v736_v2  }
  0x80   :  { %544 = vset.pattern.permute.xlu0 %v659_v30 }
  0x81   :  { %354 = vperm.xlu0 %544, %v736_v2  }
  0x83   :  { %522 = vset.pattern.permute.xlu1 %v660_v31 }
  0x84   :  { %224 = vperm.xlu1 %522, %v736_v2  }
  0x85   :  { %547 = vset.pattern.permute.xlu0 %v661_v32 }
  0x86   :  { %371 = vperm.xlu0 %547, %v736_v2  }
  0x88   :  { %524 = vset.pattern.permute.xlu1 %v662_v33 }
  0x89   :  { %236 = vperm.xlu1 %524, %v736_v2  }
  0x8a   :  { %549 = vset.pattern.permute.xlu0 %v631_v0 }
  0x8b   :  { %403 = vperm.xlu0 %549, %v792_v34  }
  0x8d   :  { %525 = vset.pattern.permute.xlu1 %v643_v14 }
  0x8e   :  { %242 = vperm.xlu1 %525, %v743_v3  }
  0x8f   :  { %552 = vset.pattern.permute.xlu0 %v634_v5  ;;  %v673_v5 = vmov 41  }
  0x90   :  { %415 = vperm.xlu0 %552, %v792_v34  }
  0x92   :  { %527 = vset.pattern.permute.xlu1 %v663_v35 }
  0x93   :  { %253 = vperm.xlu1 %527, %v736_v2  }
  0x94   :  { %554 = vset.pattern.permute.xlu0 %v635_v6 }
  0x97   :  { %528 = vset.pattern.permute.xlu1 %v664_v36 }
  0x98   :  { %259 = vperm.xlu1 %528, %v736_v2  }
  0x9c   :  { %530 = vset.pattern.permute.xlu1 %v665_v37 }
  0x9d   :  { %271 = vperm.xlu1 %530, %v736_v2  }
  0xa1   :  { %531 = vset.pattern.permute.xlu1 %v666_v38 }
  0xa2   :  { %277 = vperm.xlu1 %531, %v736_v2  }
  0xa6   :  { %533 = vset.pattern.permute.xlu1 %v667_v39 }
  0xa7   :  { %306 = vperm.xlu1 %533, %v736_v2   ;;  %v66_v41 = vpop.permute.xlu1 %65  ;;  %v54_v48 = vpop.permute.xlu0 %53 }
  0xa8   :  { %v68_v42 = vmul.f32 %v66_v41, %v807_v40  ;;  %v56_v63 = vmul.f32 %v54_v48, %v807_v40 }
  0xab   :  { %534 = vset.pattern.permute.xlu1 %v668_v43  ;;  %v71_v44 = vpop.permute.xlu1 %70  ;;  %v60_v53 = vpop.permute.xlu0 %59  ;;  %v675_v43 = vmov 0.0  }
  0xac   :  { %v73_v45 = vadd.f32 %v71_v44, %v68_v42  ;;  %312 = vperm.xlu1 %534, %v736_v2   ;;  %v62_v8 = vadd.f32 %v60_v53, %v56_v63  ;;  %47 = vst [vmem:[#allocation7] sm:$0xff] %v675_v43 }
  0xae   :  { %v825_v15 = vmax.f32 %v62_v8, 0.0 }
  0xb0   :  { %536 = vset.pattern.permute.xlu1 %v669_v46  ;;  %v82_v47 = vpop.permute.xlu1 %81  ;;  %v77_v58 = vpop.permute.xlu0 %76 }
  0xb1   :  { %324 = vperm.xlu1 %536, %v736_v2   ;;  %v79_v12 = vmul.f32 %v77_v58, %v807_v40 }
  0xb3   :  { %v84_v19 = vadd.f32 %v82_v47, %v79_v12 }
  0xb5   :  { %537 = vset.pattern.permute.xlu1 %v670_v49  ;;  %v88_v50 = vpop.permute.xlu1 %87  ;;  %v93_v60 = vpop.permute.xlu0 %92  ;;  %v836_v25 = vmax.f32 %v84_v19, 0.0 }
  0xb6   :  { %283 = vperm.xlu1 %537, %v736_v2   ;;  %v90_v14 = vmul.f32 %v88_v50, %v807_v40 }
  0xb8   :  { %v95_v22 = vadd.f32 %v93_v60, %v90_v14 }
  0xba   :  { %539 = vset.pattern.permute.xlu1 %v671_v51  ;;  %v99_v52 = vpop.permute.xlu1 %98  ;;  %v110_v62 = vpop.permute.xlu0 %109 }
  0xbb   :  { %289 = vperm.xlu1 %539, %v736_v2   ;;  %v101_v54 = vmul.f32 %v99_v52, %v807_v40  ;;  %v112_v28 = vmul.f32 %v110_v62, %v807_v40 }
  0xbe   :  { %v104_v55 = vpop.permute.xlu1 %103 }
  0xbf   :  { %v106_v56 = vadd.f32 %v104_v55, %v101_v54  ;;  %540 = vset.pattern.permute.xlu1 %v672_v57  ;;  %v126_v7 = vpop.permute.xlu0 %125 }
  0xc0   :  { %336 = vperm.xlu1 %540, %v736_v2  }
  0xc3   :  { %v115_v59 = vpop.permute.xlu1 %114 }
  0xc4   :  { %542 = vset.pattern.permute.xlu1 %v645_v16  ;;  %v828_v16 = vmax.f32 %v73_v45, 0.0  ;;  %v143_v17 = vpop.permute.xlu0 %142  ;;  %v117_v35 = vadd.f32 %v115_v59, %v112_v28 }
  0xc5   :  { %295 = vperm.xlu1 %542, %v743_v3   ;;  %v145_v24 = vmul.f32 %v143_v17, %v825_v15 }
  0xc6   :  { %v850_v41 = vmax.f32 %v117_v35, 0.0 }
  0xc8   :  { %v121_v61 = vpop.permute.xlu1 %120 }
  0xc9   :  { %543 = vset.pattern.permute.xlu1 %v639_v10  ;;  %v674_v10 = vmov 42   ;;  %v160_v26 = vpop.permute.xlu0 %159  ;;  %v123_v29 = vmul.f32 %v121_v61, %v807_v40 }
  0xca   :  { %348 = vperm.xlu1 %543, %v743_v3  }
  0xcb   :  { %v128_v36 = vadd.f32 %v126_v7, %v123_v29 }
  0xcd   :  { %v132_v0 = vpop.permute.xlu1 %131  ;;  %v852_v42 = vmax.f32 %v128_v36, 0.0 }
  0xce   :  { %545 = vset.pattern.permute.xlu1 %v673_v5  ;;  %v134_v9 = vmul.f32 %v132_v0, %v807_v40  ;;  %v178_v44 = vpop.permute.xlu0 %177 }
  0xcf   :  { %359 = vperm.xlu1 %545, %v736_v2   ;;  %v180_v47 = vmul.f32 %v178_v44, %v852_v42 }
  0xd1   :  { %v137_v11 = vpop.permute.xlu1 %136 }
  0xd2   :  { %v139_v13 = vadd.f32 %v137_v11, %v134_v9 }
  0xd3   :  { %546 = vset.pattern.permute.xlu1 %v674_v10 }
  0xd4   :  { %365 = vperm.xlu1 %546, %v736_v2   ;;  %v838_v2 = vmax.f32 %v95_v22, 0.0  ;;  %v858_v48 = vmax.f32 %v139_v13, 0.0 }
  0xd6   :  { %v148_v20 = vpop.permute.xlu1 %147  ;;  %v162_v32 = vmul.f32 %v160_v26, %v838_v2 }
  0xd7   :  { %v150_v23 = vmul.f32 %v148_v20, %v828_v16 }
  0xd8   :  { %548 = vset.pattern.permute.xlu1 %v632_v1  ;;  %v845_v1 = vmax.f32 %v106_v56, 0.0 }
  0xd9   :  { %391 = vperm.xlu1 %548, %v388_v21   ;;  %v151_v30 = vadd.f32 %v150_v23, %v145_v24 }
  0xdb   :  { %v154_v27 = vpop.permute.xlu1 %153 }
  0xdc   :  { %v156_v31 = vmul.f32 %v154_v27, %v836_v25 }
  0xdd   :  { %397 = vperm.xlu1 %548, %v792_v34  }
  0xde   :  { %v157_v33 = vadd.f32 %v156_v31, %v151_v30 }
  0xe0   :  { %v166_v37 = vpop.permute.xlu1 %165  ;;  %v163_v38 = vadd.f32 %v162_v32, %v157_v33 }
  0xe1   :  { %v168_v39 = vmul.f32 %v166_v37, %v845_v1  ;;  %550 = vset.pattern.permute.xlu1 %v633_v4 }
  0xe2   :  { %409 = vperm.xlu1 %550, %v792_v34  }
  0xe3   :  { %v169_v40 = vadd.f32 %v168_v39, %v163_v38 }
  0xe5   :  { %v172_v45 = vpop.permute.xlu1 %171 }
  0xe6   :  { %v174_v46 = vmul.f32 %v172_v45, %v850_v41  ;;  %551 = vset.pattern.permute.xlu1 %v647_v18  ;;  %v196_v18 = vpop.permute.xlu0 %195 }
  0xe7   :  { %377 = vperm.xlu1 %551, %v743_v3   ;;  %v198_v56 = vmul.f32 %v196_v18, %v825_v15 }
  0xe8   :  { %v175_v4 = vadd.f32 %v174_v46, %v169_v40 }
  0xea   :  { %v184_v49 = vpop.permute.xlu1 %183  ;;  %v181_v50 = vadd.f32 %v180_v47, %v175_v4  ;;  %v213_v57 = vpop.permute.xlu0 %212 }
  0xeb   :  { %v186_v51 = vmul.f32 %v184_v49, %v858_v48  ;;  %553 = vset.pattern.permute.xlu1 %v635_v6  ;;  %v215_v61 = vmul.f32 %v213_v57, %v838_v2 }
  0xec   :  { %421 = vperm.xlu1 %553, %v792_v34  }
  0xed   :  { %v187_v52 = vadd.f32 %v186_v51, %v181_v50 }
  0xee   :  { %v231_v5 = vpop.permute.xlu0 %230 }
  0xef   :  { %v190_v53 = vpop.permute.xlu1 %189  ;;  %v233_v9 = vmul.f32 %v231_v5, %v852_v42 }
  0xf0   :  { %v863_v54 = vadd.f32 %v190_v53, %v187_v52 }
  0xf2   :  { %v249_v19 = vpop.permute.xlu0 %248 }
  0xf3   :  { %v251_v22 = vmul.f32 %v249_v19, %v825_v15 }
  0xf4   :  { %v201_v55 = vpop.permute.xlu1 %200 }
  0xf5   :  { %v203_v3 = vmul.f32 %v201_v55, %v828_v16 }
  0xf6   :  { %v266_v23 = vpop.permute.xlu0 %265 }
  0xf7   :  { %v204_v59 = vadd.f32 %v203_v3, %v198_v56  ;;  %v268_v28 = vmul.f32 %v266_v23, %v838_v2  ;;  %v386_v23 = vld [vmem:[#allocation2 + $0x8] sm:$0xff] }
  0xf9   :  { %v207_v58 = vpop.permute.xlu1 %206 }
  0xfa   :  { %v209_v60 = vmul.f32 %v207_v58, %v836_v25  ;;  %v302_v37 = vpop.permute.xlu0 %301 }
  0xfb   :  { %v304_v43 = vmul.f32 %v302_v37, %v825_v15 }
  0xfc   :  { %v210_v6 = vadd.f32 %v209_v60, %v204_v59 }
  0xfe   :  { %v219_v62 = vpop.permute.xlu1 %218  ;;  %v216_v34 = vadd.f32 %v215_v61, %v210_v6  ;;  %v319_v44 = vpop.permute.xlu0 %318 }
  0xff   :  { %v221_v63 = vmul.f32 %v219_v62, %v845_v1  ;;  %v321_v4 = vmul.f32 %v319_v44, %v838_v2 }
 0x101   :  { %v222_v0 = vadd.f32 %v221_v63, %v216_v34 }
 0x102   :  { %v331_v50 = vpop.permute.xlu0 %330 }
 0x103   :  { %v225_v7 = vpop.permute.xlu1 %224  ;;  %v333_v18 = vmul.f32 %v331_v50, %v850_v41 }
 0x104   :  { %v227_v8 = vmul.f32 %v225_v7, %v850_v41 }
 0x106   :  { %v228_v11 = vadd.f32 %v227_v8, %v222_v0  ;;  %v343_v59 = vpop.permute.xlu0 %342  ;;  %v193_v0 = vmax.f32 %v863_v54, 0.0 }
 0x107   :  { %v345_v61 = vmul.f32 %v343_v59, %v858_v48 }
 0x108   :  { %v237_v12 = vpop.permute.xlu1 %236  ;;  %v234_v13 = vadd.f32 %v233_v9, %v228_v11 }
 0x109   :  { %v239_v14 = vmul.f32 %v237_v12, %v858_v48 }
 0x10a   :  { %v355_v63 = vpop.permute.xlu0 %354 }
 0x10b   :  { %v240_v10 = vadd.f32 %v239_v14, %v234_v13  ;;  %v357_v11 = vmul.f32 %v355_v63, %v193_v0 }
 0x10d   :  { %v243_v17 = vpop.permute.xlu1 %242 }
 0x112   :  { %v254_v20 = vpop.permute.xlu1 %253 }
 0x113   :  { %v256_v21 = vmul.f32 %v254_v20, %v828_v16 }
 0x115   :  { %v257_v26 = vadd.f32 %v256_v21, %v251_v22 }
 0x117   :  { %v260_v24 = vpop.permute.xlu1 %259 }
 0x118   :  { %v262_v27 = vmul.f32 %v260_v24, %v836_v25  ;;  %v444_v24 = vtrunc.f32 %v386_v23 }
 0x11a   :  { %v263_v29 = vadd.f32 %v262_v27, %v257_v26  ;;  %v445_v54 = vcvt.f32.s32 %v444_v24 }
 0x11c   :  { %v272_v30 = vpop.permute.xlu1 %271  ;;  %v269_v31 = vadd.f32 %v268_v28, %v263_v29  ;;  %vm394_vm0 = vcmp.eq.s32.totalorder %v445_v54, 0  ;;  %vm401_vm1 = vcmp.eq.s32.totalorder %v445_v54, 1  ;;  %vm407_vm2 = vcmp.eq.s32.totalorder %v445_v54, 2 }
 0x11d   :  { %v274_v32 = vmul.f32 %v272_v30, %v845_v1  ;;  %vm413_vm3 = vcmp.eq.s32.totalorder %v445_v54, 3  ;;  %vm419_vm4 = vcmp.eq.s32.totalorder %v445_v54, 4 }
 0x11f   :  { %v275_v33 = vadd.f32 %v274_v32, %v269_v31 }
 0x121   :  { %v278_v35 = vpop.permute.xlu1 %277 }
 0x122   :  { %v280_v36 = vmul.f32 %v278_v35, %v850_v41  ;;  %v245_v41 = vadd.f32 %v243_v17, %v240_v10 }
 0x124   :  { %v281_v38 = vadd.f32 %v280_v36, %v275_v33  ;;  %v246_v5 = vmax.f32 %v245_v41, 0.0 }
 0x126   :  { %v307_v39 = vpop.permute.xlu1 %306 }
 0x127   :  { %v309_v40 = vmul.f32 %v307_v39, %v828_v16 }
 0x129   :  { %v310_v46 = vadd.f32 %v309_v40, %v304_v43 }
 0x12b   :  { %v313_v45 = vpop.permute.xlu1 %312 }
 0x12c   :  { %v315_v47 = vmul.f32 %v313_v45, %v836_v25 }
 0x12e   :  { %v316_v49 = vadd.f32 %v315_v47, %v310_v46 }
 0x130   :  { %v325_v51 = vpop.permute.xlu1 %324  ;;  %v322_v52 = vadd.f32 %v321_v4, %v316_v49 }
 0x131   :  { %v327_v53 = vmul.f32 %v325_v51, %v845_v1 }
 0x133   :  { %v328_v55 = vadd.f32 %v327_v53, %v322_v52 }
 0x135   :  { %v284_v3 = vpop.permute.xlu1 %283  ;;  %v334_v16 = vadd.f32 %v333_v18, %v328_v55 }
 0x136   :  { %v286_v15 = vmul.f32 %v284_v3, %v852_v42 }
 0x138   :  { %v287_v56 = vadd.f32 %v286_v15, %v281_v38 }
 0x13a   :  { %v290_v57 = vpop.permute.xlu1 %289 }
 0x13b   :  { %v292_v58 = vmul.f32 %v290_v57, %v858_v48 }
 0x13d   :  { %v293_v25 = vadd.f32 %v292_v58, %v287_v56 }
 0x13f   :  { %v337_v2 = vpop.permute.xlu1 %336 }
 0x140   :  { %v339_v60 = vmul.f32 %v337_v2, %v852_v42  ;;  %v372_v42 = vpop.permute.xlu0 %371 }
 0x142   :  { %v340_v6 = vadd.f32 %v339_v60, %v334_v16 }
 0x144   :  { %v296_v1 = vpop.permute.xlu1 %295  ;;  %v346_v62 = vadd.f32 %v345_v61, %v340_v6  ;;  %v404_v28 = vpop.permute.xlu0 %403 }
 0x145   :  { %v298_v7 = vadd.f32 %v296_v1, %v293_v25 }
 0x147   :  { %v299_v14 = vmax.f32 %v298_v7, 0.0 }
 0x148   :  { %v416_v35 = vpop.permute.xlu0 %415 }
 0x149   :  { %v349_v34 = vpop.permute.xlu1 %348 }
 0x14a   :  { %v351_v8 = vadd.f32 %v349_v34, %v346_v62 }
 0x14c   :  { %v352_v19 = vmax.f32 %v351_v8, 0.0 }
 0x14e   :  { %v360_v9 = vpop.permute.xlu1 %359  ;;  %v374_v21 = vmul.f32 %v372_v42, %v352_v19 }
 0x14f   :  { %v362_v12 = vmul.f32 %v360_v9, %v246_v5 }
 0x151   :  { %v363_v13 = vadd.f32 %v362_v12, %v357_v11 }
 0x153   :  { %v366_v20 = vpop.permute.xlu1 %365 }
 0x154   :  { %v368_v48 = vmul.f32 %v366_v20, %v299_v14 }
 0x156   :  { %v369_v22 = vadd.f32 %v368_v48, %v363_v13 }
 0x158   :  { %v392_v10 = vpop.permute.xlu1 %391  ;;  %v375_v17 = vadd.f32 %v374_v21, %v369_v22 }
 0x15c   :  { %v398_v26 = vpop.permute.xlu1 %397 }
 0x15d   :  { %v400_v29 = vsel %vm394_vm0, %v398_v26, %v392_v10 }
 0x15e   :  { %v406_v31 = vsel %vm401_vm1, %v404_v28, %v400_v29 }
 0x161   :  { %v410_v27 = vpop.permute.xlu1 %409 }
 0x162   :  { %v412_v33 = vsel %vm407_vm2, %v410_v27, %v406_v31 }
 0x163   :  { %v418_v36 = vsel %vm413_vm3, %v416_v35, %v412_v33 }
 0x166   :  { %v378_v30 = vpop.permute.xlu1 %377 }
 0x167   :  { %v380_v32 = vadd.f32 %v378_v30, %v375_v17 }
 0x169   :  { %381 = vst [vmem:[#allocation7] sm:$0x1] %v380_v32  ;;  %382 = vst [vmem:[#allocation7 + $0x1] sm:$0x2] %v380_v32 }
 0x16a   :  { %383 = vst [vmem:[#allocation7 + $0x2] sm:$0xc] %v380_v32  }
 0x16b   :  { %v422_v37 = vpop.permute.xlu1 %421 }
 0x16c   :  { %v424_v38 = vsel %vm419_vm4, %v422_v37, %v418_v36 }
 0x16d   :  { %425 = vst [vmem:[#allocation7 + $0x1] sm:$0x1] %v424_v38  ;;  %426 = vst [vmem:[#allocation7 + $0x2] sm:$0x2] %v424_v38 }
 0x16e   :  { %427 = vst [vmem:[#allocation7 + $0x4] sm:$0x4] %v424_v38 }
 0x16f   :  { %610 = shalt.err (!%p607_p6)
}
 0x170   :  { %s611_s25 = scalar_lea.hbm %s907_s5, 128 }
 0x171   :  { %p612_p7 = scmp.ne.s32.totalorder %s907_s5, %s611_s25  ;;  %p615_p8 = scmp.lt.u32.totalorder %s611_s25, %s907_s5 }
 0x173   :  { %p617_p9 = pnand %p615_p8, %p612_p7 }
 0x175   :  { %620 = shalt.err (!%p617_p9)
}
 0x176   :  { %437 = dma.vmem_to_hbm [thread:$0]  %s435_s21, 128, %s907_s5, [#allocation4]  }
 0x177   :  { %625 = dma.done.wait [#allocation4], 128  }
 0x178   :  { %626 = vsyncadd [#allocation4], 4294967168 }
 0x179   :  { %441 = vsyncpa [#allocation3], 1 }
 0x17a   :  { %442 = vsyncpa [#allocation6], 1 }
 0x17b   :  { %443 = vsyncpa [#allocation4], 1 }

</bundles_post_ra>
